<compile_context>
chip_gen: v7x
topology: tpu7x:2x2x1
jax: 0.10.0
libtpu: 0.0.40
codegen_flags: <defaults>
</compile_context>

<pallas_src>
import jax
import jax.numpy as jnp
from jax.experimental import pallas as pl
from jax.experimental.pallas import tpu as pltpu

LANE = 128           # vreg lane width
MAX_BATCH_TILE = 512  # sized conservatively for v7x's 64 MiB VMEM (tiny here anyway)


def _round_up(n, m):
    return ((n + m - 1) // m) * m


def _pad2d(a, rows, cols):
    return jnp.pad(a, ((0, rows - a.shape[0]), (0, cols - a.shape[1])))


def _mlp_kernel(x_ref,
                w0_ref, b0_ref,
                w1_ref, b1_ref,
                w2_ref, b2_ref,
                w3_ref, b3_ref,
                o_ref):
    # input_layer + ReLU  (bf16 matmul, f32 accumulate, f32 elementwise)
    h = jnp.dot(x_ref[...], w0_ref[...], preferred_element_type=jnp.float32)
    h = jnp.maximum(h + b0_ref[...], 0.0)
    # layer1 + ReLU
    h = jnp.dot(h.astype(jnp.bfloat16), w1_ref[...], preferred_element_type=jnp.float32)
    h = jnp.maximum(h + b1_ref[...], 0.0)
    # layer2 + ReLU
    h = jnp.dot(h.astype(jnp.bfloat16), w2_ref[...], preferred_element_type=jnp.float32)
    h = jnp.maximum(h + b2_ref[...], 0.0)
    # output_layer (no activation); lane-dense [TB, 128] store
    out = jnp.dot(h.astype(jnp.bfloat16), w3_ref[...], preferred_element_type=jnp.float32)
    o_ref[...] = (out + b3_ref[...]).astype(o_ref.dtype)


def supervised_simple_nn_forward(x, params, *, block_b=MAX_BATCH_TILE):
    """x: [B, input_size] float32. params: dict of (W, b) per layer, W: [in, out], b: [1, out]."""
    (w0, b0), (w1, b1), (w2, b2), (w3, b3) = (
        params["input_layer"], params["layer1"], params["layer2"], params["output_layer"]
    )
    B, in_size = x.shape
    h0, h1, h2, out_size = w0.shape[1], w1.shape[1], w2.shape[1], w3.shape[1]

    # Pad every layer width to the 128-lane vreg width (exact: zero pads contribute 0).
    h0p, h1p, h2p, outp = (_round_up(d, LANE) for d in (h0, h1, h2, out_size))

    w0p = _pad2d(w0, in_size, h0p).astype(jnp.bfloat16)
    w1p = _pad2d(w1, h0p, h1p).astype(jnp.bfloat16)
    w2p = _pad2d(w2, h1p, h2p).astype(jnp.bfloat16)
    w3p = _pad2d(w3, h2p, outp).astype(jnp.bfloat16)
    b0p = _pad2d(b0, 1, h0p).astype(jnp.float32)
    b1p = _pad2d(b1, 1, h1p).astype(jnp.float32)
    b2p = _pad2d(b2, 1, h2p).astype(jnp.float32)
    b3p = _pad2d(b3, 1, outp).astype(jnp.float32)

    # Batch tiling: largest tile <= block_b, batch padded to a multiple of the tile.
    tb = min(block_b, _round_up(B, 8))
    b_pad = _round_up(B, tb)
    xp = jnp.pad(x, ((0, b_pad - B), (0, 0))).astype(jnp.bfloat16)

    grid = (pl.cdiv(b_pad, tb),)
    const = lambda i: (0, 0)  # weights/biases: same block every step -> VMEM-resident

    out_padded = pl.pallas_call(
        _mlp_kernel,
        out_shape=jax.ShapeDtypeStruct((b_pad, outp), jnp.float32),
        grid=grid,
        in_specs=[
            pl.BlockSpec((tb, in_size), lambda i: (i, 0)),          # x tile
            pl.BlockSpec((in_size, h0p), const), pl.BlockSpec((1, h0p), const),
            pl.BlockSpec((h0p, h1p), const),     pl.BlockSpec((1, h1p), const),
            pl.BlockSpec((h1p, h2p), const),     pl.BlockSpec((1, h2p), const),
            pl.BlockSpec((h2p, outp), const),    pl.BlockSpec((1, outp), const),
        ],
        out_specs=pl.BlockSpec((tb, outp), lambda i: (i, 0)),
        compiler_params=pltpu.CompilerParams(
            dimension_semantics=("parallel",),   # v7x: split batch grid over both TCs
        ),
    )(xp, w0p, b0p, w1p, b1p, w2p, b2p, w3p, b3p)

    return out_padded[:B, :out_size]


def init_params(key, input_size, hidden_size, output_size):
    """Deterministic init mimicking PyTorch nn.Linear default (uniform +-1/sqrt(fan_in))."""
    dims = [
        (input_size, hidden_size),             # input_layer
        (hidden_size, hidden_size // 2),       # layer1
        (hidden_size // 2, hidden_size // 4),  # layer2
        (hidden_size // 4, output_size),       # output_layer
    ]
    names = ["input_layer", "layer1", "layer2", "output_layer"]
    params = {}
    for name, (fan_in, fan_out) in zip(names, dims):
        key, kw, kb = jax.random.split(key, 3)
        bound = 1.0 / (fan_in ** 0.5)
        w = jax.random.uniform(kw, (fan_in, fan_out), jnp.float32, -bound, bound)
        b = jax.random.uniform(kb, (1, fan_out), jnp.float32, -bound, bound)
        params[name] = (w, b)
    return params


def reference_forward_f32(x, params):
    (w0, b0), (w1, b1), (w2, b2), (w3, b3) = (
        params["input_layer"], params["layer1"], params["layer2"], params["output_layer"]
    )
    h = jnp.maximum(x @ w0 + b0, 0.0)
    h = jnp.maximum(h @ w1 + b1, 0.0)
    h = jnp.maximum(h @ w2 + b2, 0.0)
    return h @ w3 + b3


def reference_forward_bf16(x, params):
    """Pure-JAX reference matching the kernel's numerics (bf16 matmul, f32 accumulate)."""
    (w0, b0), (w1, b1), (w2, b2), (w3, b3) = (
        params["input_layer"], params["layer1"], params["layer2"], params["output_layer"]
    )
    bf = lambda a: a.astype(jnp.bfloat16)
    h = jnp.dot(bf(x), bf(w0), preferred_element_type=jnp.float32) + b0
    h = jnp.maximum(h, 0.0)
    h = jnp.dot(bf(h), bf(w1), preferred_element_type=jnp.float32) + b1
    h = jnp.maximum(h, 0.0)
    h = jnp.dot(bf(h), bf(w2), preferred_element_type=jnp.float32) + b2
    h = jnp.maximum(h, 0.0)
    return jnp.dot(bf(h), bf(w3), preferred_element_type=jnp.float32) + b3


if __name__ == "__main__":
    # Shapes consistent with the module's __init__.
    batch = 8
    input_size = 64
    hidden_size = 32
    output_size = 10

    key = jax.random.PRNGKey(0)
    key, kx, kx2 = jax.random.split(key, 3)
    x = jax.random.normal(kx, (batch, input_size), jnp.float32)
    params = init_params(key, input_size, hidden_size, output_size)

    # Single-tile path.
    out = jax.block_until_ready(supervised_simple_nn_forward(x, params))
    assert out.shape == (batch, output_size)
    ref_bf16 = reference_forward_bf16(x, params)
    ref_f32 = reference_forward_f32(x, params)
    assert jnp.allclose(out, ref_bf16, atol=1e-3, rtol=1e-3), "mismatch vs bf16-matched reference"
    assert jnp.allclose(out, ref_f32, atol=3e-2, rtol=3e-2), "mismatch vs f32 module reference"

    # Multi-tile path (grid > 1, batch not a multiple of the tile) to exercise tiling/padding.
    batch2 = 520
    x2 = jax.random.normal(kx2, (batch2, input_size), jnp.float32)
    out2 = jax.block_until_ready(supervised_simple_nn_forward(x2, params))
    assert out2.shape == (batch2, output_size)
    assert jnp.allclose(out2, reference_forward_bf16(x2, params), atol=1e-3, rtol=1e-3), \
        "mismatch vs bf16-matched reference (tiled path)"

    print("KERNEL_OK")
</pallas_src>

<mosaic_0001>
module attributes {stable_mosaic.version = 11 : i64} {
  func.func @_mlp_kernel(%arg0: i32, %arg1: memref<8x64xbf16, #tpu.memory_space<vmem>>, %arg2: memref<64x128xbf16, #tpu.memory_space<vmem>>, %arg3: memref<1x128xf32, #tpu.memory_space<vmem>>, %arg4: memref<128x128xbf16, #tpu.memory_space<vmem>>, %arg5: memref<1x128xf32, #tpu.memory_space<vmem>>, %arg6: memref<128x128xbf16, #tpu.memory_space<vmem>>, %arg7: memref<1x128xf32, #tpu.memory_space<vmem>>, %arg8: memref<128x128xbf16, #tpu.memory_space<vmem>>, %arg9: memref<1x128xf32, #tpu.memory_space<vmem>>, %arg10: memref<8x128xf32, #tpu.memory_space<vmem>>) attributes {dimension_semantics = [#tpu.dimension_semantics<parallel>], iteration_bounds = array<i64: 1>, scalar_prefetch = 0 : i64, scratch_operands = 0 : i64, tpu.core_type = #tpu.core_type<tc>, window_params = [{transform_indices = @transform_0, window_bounds = array<i64: 8, 64>}, {pipeline_mode = #tpu.pipeline_mode<synchronous>, transform_indices = @transform_1, window_bounds = array<i64: 64, 128>}, {pipeline_mode = #tpu.pipeline_mode<synchronous>, transform_indices = @transform_2, window_bounds = array<i64: 1, 128>}, {pipeline_mode = #tpu.pipeline_mode<synchronous>, transform_indices = @transform_3, window_bounds = array<i64: 128, 128>}, {pipeline_mode = #tpu.pipeline_mode<synchronous>, transform_indices = @transform_4, window_bounds = array<i64: 1, 128>}, {pipeline_mode = #tpu.pipeline_mode<synchronous>, transform_indices = @transform_5, window_bounds = array<i64: 128, 128>}, {pipeline_mode = #tpu.pipeline_mode<synchronous>, transform_indices = @transform_6, window_bounds = array<i64: 1, 128>}, {pipeline_mode = #tpu.pipeline_mode<synchronous>, transform_indices = @transform_7, window_bounds = array<i64: 128, 128>}, {pipeline_mode = #tpu.pipeline_mode<synchronous>, transform_indices = @transform_8, window_bounds = array<i64: 1, 128>}, {transform_indices = @transform_9, window_bounds = array<i64: 8, 128>}]} {
    %c0 = arith.constant 0 : index
    %c0_0 = arith.constant 0 : index
    %0 = vector.load %arg1[%c0, %c0_0] : memref<8x64xbf16, #tpu.memory_space<vmem>>, vector<8x64xbf16>
    %c0_1 = arith.constant 0 : index
    %c0_2 = arith.constant 0 : index
    %1 = vector.load %arg2[%c0_1, %c0_2] : memref<64x128xbf16, #tpu.memory_space<vmem>>, vector<64x128xbf16>
    %cst = arith.constant dense<0.000000e+00> : vector<8x128xf32>
    %2 = tpu.matmul %0, %1, %cst {dimension_numbers = #tpu.dot_dimension_numbers<[1], [0], [0], [1], [0, 0, 1, 1], [], []>} : vector<8x64xbf16>, vector<64x128xbf16>, vector<8x128xf32> -> vector<8x128xf32>
    %c0_3 = arith.constant 0 : index
    %c0_4 = arith.constant 0 : index
    %3 = vector.load %arg3[%c0_3, %c0_4] : memref<1x128xf32, #tpu.memory_space<vmem>>, vector<1x128xf32>
    %4 = vector.broadcast %3 : vector<1x128xf32> to vector<8x128xf32>
    %5 = arith.addf %2, %4 : vector<8x128xf32>
    %cst_5 = arith.constant 0.000000e+00 : f32
    %6 = vector.broadcast %cst_5 : f32 to vector<8x128xf32>
    %7 = arith.maximumf %5, %6 : vector<8x128xf32>
    %8 = arith.truncf %7 : vector<8x128xf32> to vector<8x128xbf16>
    %c0_6 = arith.constant 0 : index
    %c0_7 = arith.constant 0 : index
    %9 = vector.load %arg4[%c0_6, %c0_7] : memref<128x128xbf16, #tpu.memory_space<vmem>>, vector<128x128xbf16>
    %cst_8 = arith.constant dense<0.000000e+00> : vector<8x128xf32>
    %10 = tpu.matmul %8, %9, %cst_8 {dimension_numbers = #tpu.dot_dimension_numbers<[1], [0], [0], [1], [0, 0, 1, 1], [], []>} : vector<8x128xbf16>, vector<128x128xbf16>, vector<8x128xf32> -> vector<8x128xf32>
    %c0_9 = arith.constant 0 : index
    %c0_10 = arith.constant 0 : index
    %11 = vector.load %arg5[%c0_9, %c0_10] : memref<1x128xf32, #tpu.memory_space<vmem>>, vector<1x128xf32>
    %12 = vector.broadcast %11 : vector<1x128xf32> to vector<8x128xf32>
    %13 = arith.addf %10, %12 : vector<8x128xf32>
    %cst_11 = arith.constant 0.000000e+00 : f32
    %14 = vector.broadcast %cst_11 : f32 to vector<8x128xf32>
    %15 = arith.maximumf %13, %14 : vector<8x128xf32>
    %16 = arith.truncf %15 : vector<8x128xf32> to vector<8x128xbf16>
    %c0_12 = arith.constant 0 : index
    %c0_13 = arith.constant 0 : index
    %17 = vector.load %arg6[%c0_12, %c0_13] : memref<128x128xbf16, #tpu.memory_space<vmem>>, vector<128x128xbf16>
    %cst_14 = arith.constant dense<0.000000e+00> : vector<8x128xf32>
    %18 = tpu.matmul %16, %17, %cst_14 {dimension_numbers = #tpu.dot_dimension_numbers<[1], [0], [0], [1], [0, 0, 1, 1], [], []>} : vector<8x128xbf16>, vector<128x128xbf16>, vector<8x128xf32> -> vector<8x128xf32>
    %c0_15 = arith.constant 0 : index
    %c0_16 = arith.constant 0 : index
    %19 = vector.load %arg7[%c0_15, %c0_16] : memref<1x128xf32, #tpu.memory_space<vmem>>, vector<1x128xf32>
    %20 = vector.broadcast %19 : vector<1x128xf32> to vector<8x128xf32>
    %21 = arith.addf %18, %20 : vector<8x128xf32>
    %cst_17 = arith.constant 0.000000e+00 : f32
    %22 = vector.broadcast %cst_17 : f32 to vector<8x128xf32>
    %23 = arith.maximumf %21, %22 : vector<8x128xf32>
    %24 = arith.truncf %23 : vector<8x128xf32> to vector<8x128xbf16>
    %c0_18 = arith.constant 0 : index
    %c0_19 = arith.constant 0 : index
    %25 = vector.load %arg8[%c0_18, %c0_19] : memref<128x128xbf16, #tpu.memory_space<vmem>>, vector<128x128xbf16>
    %cst_20 = arith.constant dense<0.000000e+00> : vector<8x128xf32>
    %26 = tpu.matmul %24, %25, %cst_20 {dimension_numbers = #tpu.dot_dimension_numbers<[1], [0], [0], [1], [0, 0, 1, 1], [], []>} : vector<8x128xbf16>, vector<128x128xbf16>, vector<8x128xf32> -> vector<8x128xf32>
    %c0_21 = arith.constant 0 : index
    %c0_22 = arith.constant 0 : index
    %27 = vector.load %arg9[%c0_21, %c0_22] : memref<1x128xf32, #tpu.memory_space<vmem>>, vector<1x128xf32>
    %28 = vector.broadcast %27 : vector<1x128xf32> to vector<8x128xf32>
    %29 = arith.addf %26, %28 : vector<8x128xf32>
    %c0_23 = arith.constant 0 : index
    %c0_24 = arith.constant 0 : index
    %30 = vector.load %arg10[%c0_23, %c0_24] : memref<8x128xf32, #tpu.memory_space<vmem>>, vector<8x128xf32>
    tpu.vector_store %arg10[%c0_23, %c0_24], %29 {strides = array<i32>} : memref<8x128xf32, #tpu.memory_space<vmem>>, vector<8x128xf32>,
    return
  }
  func.func @transform_0(%arg0: i32) -> (i32, i32) {
    %c0_i32 = arith.constant 0 : i32
    %c0_i32_0 = arith.constant 0 : i32
    return %arg0, %c0_i32 : i32, i32
  }
  func.func @transform_1(%arg0: i32) -> (i32, i32) {
    %c0_i32 = arith.constant 0 : i32
    %c0_i32_0 = arith.constant 0 : i32
    %c0_i32_1 = arith.constant 0 : i32
    return %c0_i32, %c0_i32_0 : i32, i32
  }
  func.func @transform_2(%arg0: i32) -> (i32, i32) {
    %c0_i32 = arith.constant 0 : i32
    %c0_i32_0 = arith.constant 0 : i32
    %c0_i32_1 = arith.constant 0 : i32
    return %c0_i32, %c0_i32_0 : i32, i32
  }
  func.func @transform_3(%arg0: i32) -> (i32, i32) {
    %c0_i32 = arith.constant 0 : i32
    %c0_i32_0 = arith.constant 0 : i32
    %c0_i32_1 = arith.constant 0 : i32
    return %c0_i32, %c0_i32_0 : i32, i32
  }
  func.func @transform_4(%arg0: i32) -> (i32, i32) {
    %c0_i32 = arith.constant 0 : i32
    %c0_i32_0 = arith.constant 0 : i32
    %c0_i32_1 = arith.constant 0 : i32
    return %c0_i32, %c0_i32_0 : i32, i32
  }
  func.func @transform_5(%arg0: i32) -> (i32, i32) {
    %c0_i32 = arith.constant 0 : i32
    %c0_i32_0 = arith.constant 0 : i32
    %c0_i32_1 = arith.constant 0 : i32
    return %c0_i32, %c0_i32_0 : i32, i32
  }
  func.func @transform_6(%arg0: i32) -> (i32, i32) {
    %c0_i32 = arith.constant 0 : i32
    %c0_i32_0 = arith.constant 0 : i32
    %c0_i32_1 = arith.constant 0 : i32
    return %c0_i32, %c0_i32_0 : i32, i32
  }
  func.func @transform_7(%arg0: i32) -> (i32, i32) {
    %c0_i32 = arith.constant 0 : i32
    %c0_i32_0 = arith.constant 0 : i32
    %c0_i32_1 = arith.constant 0 : i32
    return %c0_i32, %c0_i32_0 : i32, i32
  }
  func.func @transform_8(%arg0: i32) -> (i32, i32) {
    %c0_i32 = arith.constant 0 : i32
    %c0_i32_0 = arith.constant 0 : i32
    %c0_i32_1 = arith.constant 0 : i32
    return %c0_i32, %c0_i32_0 : i32, i32
  }
  func.func @transform_9(%arg0: i32) -> (i32, i32) {
    %c0_i32 = arith.constant 0 : i32
    %c0_i32_0 = arith.constant 0 : i32
    return %arg0, %c0_i32 : i32, i32
  }
}

</mosaic_0001>

<bundles_post_ra>
// kernel: tpu_custom_call.1
= control target key start
LH: loop header
LB: loop body
LE: loop exit
PB: predicated region body
PF: predicated region fallthrough
CT: control target
= control target key end

     0   :  { %14 = vsyncpa [#allocation3], 0  ;;  %s1048_s0 = inlined_call_operand.hbm [shape: bf16[8,64], index: 0, kind: input, shape index: {}]   ;;  %s1049_s1 = inlined_call_operand.hbm [shape: bf16[64,128], index: 1, kind: input, shape index: {}]   ;;  %s1050_s2 = inlined_call_operand.vmem [shape: f32[1,128], index: 2, kind: input, shape index: {}]   ;;  %s1051_s3 = inlined_call_operand.hbm [shape: bf16[128,128], index: 3, kind: input, shape index: {}]   ;;  %s1052_s4 = inlined_call_operand.vmem [shape: f32[1,128], index: 4, kind: input, shape index: {}]   ;;  %s1053_s5 = inlined_call_operand.hbm [shape: bf16[128,128], index: 5, kind: input, shape index: {}]   ;;  %s1054_s6 = inlined_call_operand.vmem [shape: f32[1,128], index: 6, kind: input, shape index: {}]   ;;  %s1055_s7 = inlined_call_operand.hbm [shape: bf16[128,128], index: 7, kind: input, shape index: {}]   ;;  %s1056_s8 = inlined_call_operand.vmem [shape: f32[1,128], index: 8, kind: input, shape index: {}]   ;;  %s1057_s9 = inlined_call_operand.hbm [shape: f32[8,128], index: 9, kind: output, shape index: {}]  }
   0x1   :  { %15 = vsyncpa [#allocation6], 0 }
   0x2   :  { %16 = vsyncpa [#allocation9], 0 }
   0x3   :  { %17 = vsyncpa [#allocation4], 0  ;;  %s856_s30 = smov [#allocation5]   ;;  %s716_s13 = scalar_lea.hbm %s1049_s1, 512 }
   0x4   :  { %s33_s10 = sshll.u32 %s856_s30, 4  ;;  %p717_p0 = scmp.ne.s32.totalorder %s1049_s1, %s716_s13  ;;  %s34_s10 = int_to_ptr.vmem [resolvable:$true] %s33_s10 }
   0x5   :  { %p720_p1 = scmp.lt.u32.totalorder %s716_s13, %s1049_s1 }
   0x7   :  { %p722_p2 = pnand %p720_p1, %p717_p0 }
   0x9   :  { %725 = shalt.err (!%p722_p2)
}
   0xa   :  { %s726_s18 = scalar_lea.vmem %s34_s10, 512  ;;  %p731_p4 = scmp.lt.s32.totalorder %s34_s10, %s34_s10 }
   0xb   :  { %p727_p3 = scmp.ne.s32.totalorder %s34_s10, %s726_s18  ;;  %p732_p5 = scmp.lt.s32.totalorder %s726_s18, %s726_s18 }
   0xd   :  { %p733_p6 = por %p732_p5, %p731_p4 }
   0xf   :  { %p734_p7 = pnand %p733_p6, %p727_p3 }
  0x11   :  { %737 = shalt.err (!%p734_p7)
}
  0x12   :  { %s857_s19 = smov 64   ;;  %s858_s20 = smov 4  }
  0x13   :  { %39 = dma.hbm_to_vmem [thread:$0]  %s1049_s1, 512, %s34_s10, [#allocation6], %s857_s19, %s857_s19, %s858_s20  }
  0x14   :  { %s859_s23 = smov [#allocation8]   ;;  %s860_s25 = smov [#allocation2]  }
  0x15   :  { %s61_s24 = sshll.u32 %s859_s23, 4  ;;  %s24_s26 = sshll.u32 %s860_s25, 4  ;;  %s62_s24 = int_to_ptr.vmem [resolvable:$true] %s61_s24  ;;  %s25_s26 = int_to_ptr.vmem [resolvable:$true] %s24_s26 }
  0x16   :  { %s738_s29 = scalar_lea.hbm %s1053_s5, 1024 }
  0x17   :  { %p739_p8 = scmp.ne.s32.totalorder %s1053_s5, %s738_s29  ;;  %p742_p9 = scmp.lt.u32.totalorder %s738_s29, %s1053_s5 }
  0x19   :  { %p744_p10 = pnand %p742_p9, %p739_p8 }
  0x1b   :  { %747 = shalt.err (!%p744_p10)
}
  0x1c   :  { %s748_s1 = scalar_lea.vmem %s62_s24, 1024  ;;  %p753_p12 = scmp.lt.s32.totalorder %s62_s24, %s62_s24 }
  0x1d   :  { %p749_p11 = scmp.ne.s32.totalorder %s62_s24, %s748_s1  ;;  %p754_p13 = scmp.lt.s32.totalorder %s748_s1, %s748_s1 }
  0x1f   :  { %p755_p0 = por %p754_p13, %p753_p12 }
  0x21   :  { %p756_p1 = pnand %p755_p0, %p749_p11 }
  0x23   :  { %759 = shalt.err (!%p756_p1)
}
  0x24   :  { %67 = dma.hbm_to_vmem [thread:$0]  %s1053_s5, 1024, %s62_s24, [#allocation9], %s857_s19, %s857_s19, %s858_s20  }
  0x25   :  { %s760_s17 = scalar_lea.hbm %s1048_s0, 64 }
  0x26   :  { %p761_p2 = scmp.ne.s32.totalorder %s1048_s0, %s760_s17  ;;  %p764_p3 = scmp.lt.u32.totalorder %s760_s17, %s1048_s0 }
  0x28   :  { %p766_p4 = pnand %p764_p3, %p761_p2 }
  0x2a   :  { %769 = shalt.err (!%p766_p4)
}
  0x2b   :  { %s770_s25 = scalar_lea.vmem %s25_s26, 64  ;;  %p775_p6 = scmp.lt.s32.totalorder %s25_s26, %s25_s26 }
  0x2c   :  { %p771_p5 = scmp.ne.s32.totalorder %s25_s26, %s770_s25  ;;  %p776_p7 = scmp.lt.s32.totalorder %s770_s25, %s770_s25 }
  0x2e   :  { %p777_p8 = por %p776_p7, %p775_p6 }
  0x30   :  { %p778_p9 = pnand %p777_p8, %p771_p5 }
  0x32   :  { %781 = shalt.err (!%p778_p9)
}
  0x33   :  { %27 = dma.hbm_to_vmem [thread:$0]  %s1048_s0, 64, %s25_s26, [#allocation3]  }
  0x34   :  { %s861_s27 = smov [#allocation7]   ;;  %s862_s29 = smov [#allocation10]  }
  0x35   :  { %s47_s28 = sshll.u32 %s861_s27, 4  ;;  %s75_s30 = sshll.u32 %s862_s29, 4  ;;  %s48_s28 = int_to_ptr.vmem [resolvable:$true] %s47_s28  ;;  %s76_s30 = int_to_ptr.vmem [resolvable:$true] %s75_s30 }
  0x36   :  { %s782_s13 = scalar_lea.hbm %s1051_s3, 1024 }
  0x37   :  { %p783_p10 = scmp.ne.s32.totalorder %s1051_s3, %s782_s13  ;;  %p786_p11 = scmp.lt.u32.totalorder %s782_s13, %s1051_s3 }
  0x39   :  { %p788_p12 = pnand %p786_p11, %p783_p10 }
  0x3b   :  { %791 = shalt.err (!%p788_p12)
}
  0x3c   :  { %s792_s0 = scalar_lea.vmem %s48_s28, 1024  ;;  %p797_p0 = scmp.lt.s32.totalorder %s48_s28, %s48_s28 }
  0x3d   :  { %p793_p13 = scmp.ne.s32.totalorder %s48_s28, %s792_s0  ;;  %p798_p1 = scmp.lt.s32.totalorder %s792_s0, %s792_s0 }
  0x3f   :  { %p799_p2 = por %p798_p1, %p797_p0 }
  0x41   :  { %p800_p3 = pnand %p799_p2, %p793_p13 }
  0x43   :  { %803 = shalt.err (!%p800_p3)
}
  0x44   :  { %53 = dma.hbm_to_vmem [thread:$0]  %s1051_s3, 1024, %s48_s28, [#allocation6], %s857_s19, %s857_s19, %s858_s20  }
  0x45   :  { %s804_s21 = scalar_lea.hbm %s1055_s7, 1024 }
  0x46   :  { %p805_p4 = scmp.ne.s32.totalorder %s1055_s7, %s804_s21  ;;  %p808_p5 = scmp.lt.u32.totalorder %s804_s21, %s1055_s7 }
  0x48   :  { %p810_p6 = pnand %p808_p5, %p805_p4 }
  0x4a   :  { %813 = shalt.err (!%p810_p6)
}
  0x4b   :  { %s814_s24 = scalar_lea.vmem %s76_s30, 1024  ;;  %p819_p8 = scmp.lt.s32.totalorder %s76_s30, %s76_s30 }
  0x4c   :  { %p815_p7 = scmp.ne.s32.totalorder %s76_s30, %s814_s24  ;;  %p820_p9 = scmp.lt.s32.totalorder %s814_s24, %s814_s24 }
  0x4e   :  { %p821_p10 = por %p820_p9, %p819_p8 }
  0x50   :  { %p822_p11 = pnand %p821_p10, %p815_p7 }
  0x52   :  { %825 = shalt.err (!%p822_p11)
}
  0x53   :  { %81 = dma.hbm_to_vmem [thread:$0]  %s1055_s7, 1024, %s76_s30, [#allocation9], %s857_s19, %s857_s19, %s858_s20  }
  0x54   :  { %848 = dma.done.wait [#allocation3], 64  }
  0x55   :  { %849 = vsyncadd [#allocation3], 4294967232 }
  0x56   :  { %850 = dma.done.wait [#allocation6], 1536  }
  0x57   :  { %851 = vsyncadd [#allocation6], 4294965760 }
  0x58   :  { %852 = dma.done.wait [#allocation9], 2048  }
  0x59   :  { %853 = vsyncadd [#allocation9], 4294965248  ;;  %v863_v0 = vmov 0.0   ;;  %vm864_vm0 = vmmov 0   ;;  %v688_v1 = vld [vmem:[#allocation5] sm:$0xff]   ;;  %v689_v2 = vld [vmem:[#allocation5 + $0x8] sm:$0xff]  }
  0x5a   :  { %606 = vmatprep.subr.bf16.mxu0 %v863_v0  ;;  %614 = vmatprep.mubr.msk.bf16.mxu0 %vm864_vm0, %v863_v0  ;;  %v692_v3 = vld [vmem:[#allocation7] sm:$0xff]   ;;  %v690_v4 = vld [vmem:[#allocation5 + $0x10] sm:$0xff]   ;;  %v693_v5 = vld [vmem:[#allocation7 + $0x8] sm:$0xff]   ;;  %vm140_vm1 = vcmask 523264   ;;  %s865_s11 = smov [#allocation11]  }
  0x5b   :  { %618 = vmatprep.subr.bf16.mxu1 %v863_v0  ;;  %634 = vmatprep.mubr.msk.bf16.mxu1 %vm864_vm0, %v863_v0  ;;  %v691_v6 = vld [vmem:[#allocation5 + $0x18] sm:$0xff]   ;;  %v694_v7 = vld [vmem:[#allocation7 + $0x10] sm:$0xff]   ;;  %v696_v10 = vld [vmem:[#allocation7 + $0x20] sm:$0xff]   ;;  %s530_s12 = sshll.u32 %s865_s11, 4  ;;  %s531_s12 = int_to_ptr.vmem [resolvable:$true] %s530_s12 }
  0x5c   :  { %607 = vmatpush3.bf16.msra.mxu0 %v688_v1  ;;  %619 = vmatpush3.bf16.msra.mxu1 %v692_v3  ;;  %v100_v8 = vld [vmem:[#allocation2] sm:$0xf]  ;;  %v697_v11 = vld [vmem:[#allocation7 + $0x28] sm:$0xff]   ;;  %v698_v12 = vld [vmem:[#allocation7 + $0x30] sm:$0xff]   ;;  %p831_p13 = scmp.lt.s32.totalorder %s531_s12, %s531_s12 }
  0x5d   :  { %608 = vmatprep.subr.bf16.mxu0 %v863_v0  ;;  %620 = vmatprep.subr.bf16.mxu1 %v863_v0  ;;  %v695_v9 = vld [vmem:[#allocation7 + $0x18] sm:$0xff]   ;;  %v700_v14 = vld [vmem:[#allocation8] sm:$0xff]   ;;  %v701_v15 = vld [vmem:[#allocation8 + $0x8] sm:$0xff]  }
  0x5e   :  { %v699_v13 = vld [vmem:[#allocation7 + $0x38] sm:$0xff]   ;;  %v702_v16 = vld [vmem:[#allocation8 + $0x10] sm:$0xff]   ;;  %v704_v18 = vld [vmem:[#allocation8 + $0x20] sm:$0xff]  }
  0x5f   :  { %v703_v17 = vld [vmem:[#allocation8 + $0x18] sm:$0xff]   ;;  %v705_v19 = vld [vmem:[#allocation8 + $0x28] sm:$0xff]   ;;  %v706_v28 = vld [vmem:[#allocation8 + $0x30] sm:$0xff]  }
  0x60   :  { %609 = vmatpush3.bf16.msra.mxu0 %v689_v2  ;;  %621 = vmatpush3.bf16.msra.mxu1 %v693_v5  ;;  %v541_v20 = vld [vmem:[%s1050_s2] ss:$0 sm:$0xff]  ;;  %v708_v30 = vld [vmem:[#allocation10] sm:$0xff]   ;;  %v709_v31 = vld [vmem:[#allocation10 + $0x8] sm:$0xff]  }
  0x61   :  { %610 = vmatprep.subr.bf16.mxu0 %v863_v0  ;;  %622 = vmatprep.subr.bf16.mxu1 %v863_v0  ;;  %v707_v29 = vld [vmem:[#allocation8 + $0x38] sm:$0xff]   ;;  %v710_v32 = vld [vmem:[#allocation10 + $0x10] sm:$0xff]   ;;  %v712_v34 = vld [vmem:[#allocation10 + $0x20] sm:$0xff]  }
  0x62   :  { %v711_v33 = vld [vmem:[#allocation10 + $0x18] sm:$0xff]   ;;  %v713_v35 = vld [vmem:[#allocation10 + $0x28] sm:$0xff]   ;;  %v714_v44 = vld [vmem:[#allocation10 + $0x30] sm:$0xff]  }
  0x63   :  { %v547_v36 = vld [vmem:[%s1052_s4] ss:$0 sm:$0xff] }
  0x64   :  { %611 = vmatpush3.bf16.msra.mxu0 %v690_v4  ;;  %623 = vmatpush3.bf16.msra.mxu1 %v694_v7  ;;  %v715_v45 = vld [vmem:[#allocation10 + $0x38] sm:$0xff]  }
  0x65   :  { %612 = vmatprep.subr.bf16.mxu0 %v863_v0  ;;  %624 = vmatprep.subr.bf16.mxu1 %v863_v0  ;;  %v556_v46 = vld [vmem:[%s1054_s6] ss:$0 sm:$0xff]  ;;  %s826_s6 = scalar_lea.vmem %s531_s12, 128 }
  0x66   :  { %v565_v54 = vld [vmem:[%s1056_s8] ss:$0 sm:$0xff]  ;;  %p827_p12 = scmp.ne.s32.totalorder %s531_s12, %s826_s6  ;;  %p832_p0 = scmp.lt.s32.totalorder %s826_s6, %s826_s6 }
  0x68   :  { %613 = vmatpush3.bf16.msra.mxu0 %v691_v6  ;;  %625 = vmatpush3.bf16.msra.mxu1 %v695_v9  ;;  %p833_p1 = por %p832_p0, %p831_p13 }
  0x69   :  { %638 = vmatprep.subr.bf16.mxu0 %v863_v0  ;;  %626 = vmatprep.subr.bf16.mxu1 %v863_v0 }
  0x6a   :  { %p834_p2 = pnand %p833_p1, %p827_p12 }
  0x6b   :  { %615 = vmatmul.mubr.msk.bf16.vlgmr.msra.gmra.mrb[0].mxu0 %vm140_vm1, %v100_v8 }
  0x6c   :  { %654 = vmatprep.mubr.msk.bf16.mxu0 %vm864_vm0, %v863_v0  ;;  %627 = vmatpush3.bf16.msra.mxu1 %v696_v10 }
  0x6d   :  { %628 = vmatprep.subr.bf16.mxu1 %v863_v0  ;;  %639 = vmatpush3.bf16.msra.mxu0 %v700_v14 }
  0x6e   :  { %640 = vmatprep.subr.bf16.mxu0 %v863_v0 }
  0x70   :  { %629 = vmatpush3.bf16.msra.mxu1 %v697_v11 }
  0x71   :  { %630 = vmatprep.subr.bf16.mxu1 %v863_v0  ;;  %641 = vmatpush3.bf16.msra.mxu0 %v701_v15 }
  0x72   :  { %642 = vmatprep.subr.bf16.mxu0 %v863_v0 }
  0x74   :  { %631 = vmatpush3.bf16.msra.mxu1 %v698_v12 }
  0x75   :  { %632 = vmatprep.subr.bf16.mxu1 %v863_v0  ;;  %643 = vmatpush3.bf16.msra.mxu0 %v702_v16 }
  0x76   :  { %644 = vmatprep.subr.bf16.mxu0 %v863_v0 }
  0x78   :  { %633 = vmatpush3.bf16.msra.mxu1 %v699_v13 }
  0x79   :  { %658 = vmatprep.subr.bf16.mxu1 %v863_v0  ;;  %645 = vmatpush3.bf16.msra.mxu0 %v703_v17 }
  0x7a   :  { %646 = vmatprep.subr.bf16.mxu0 %v863_v0 }
  0x7d   :  { %647 = vmatpush3.bf16.msra.mxu0 %v704_v18 }
  0x7e   :  { %648 = vmatprep.subr.bf16.mxu0 %v863_v0 }
  0x81   :  { %649 = vmatpush3.bf16.msra.mxu0 %v705_v19 }
  0x82   :  { %650 = vmatprep.subr.bf16.mxu0 %v863_v0 }
  0x85   :  { %651 = vmatpush3.bf16.msra.mxu0 %v706_v28 }
  0x86   :  { %652 = vmatprep.subr.bf16.mxu0 %v863_v0 }
  0x89   :  { %653 = vmatpush3.bf16.msra.mxu0 %v707_v29 }
 0x13e   :  { %v178_v21 = vpop.f32.mrb[0].mxu0 }
 0x13f   :  { %v179_v22 = vadd.f32 %v541_v20, %v178_v21  ;;  %v616_v23 = vpop.f32.mrb[1].mxu0 }
 0x140   :  { %v181_v24 = vpop.f32.mrb[2].mxu0 }
 0x141   :  { %v184_v25 = vmax.f32 %v179_v22, 0.0  ;;  %v617_v26 = vpop.f32.mrb[3].mxu0 }
 0x143   :  { %v185_v27 = vpack.c.bf16 %v184_v25, %v184_v25 }
 0x145   :  { %635 = vmatmul.mubr.bf16.vlgmr.msra.gmra.mrb[0].mxu1 %v185_v27 }
 0x146   :  { %674 = vmatprep.mubr.msk.bf16.mxu1 %vm864_vm0, %v863_v0  ;;  %659 = vmatpush3.bf16.msra.mxu1 %v708_v30 }
 0x147   :  { %660 = vmatprep.subr.bf16.mxu1 %v863_v0 }
 0x14a   :  { %661 = vmatpush3.bf16.msra.mxu1 %v709_v31 }
 0x14b   :  { %662 = vmatprep.subr.bf16.mxu1 %v863_v0 }
 0x14e   :  { %663 = vmatpush3.bf16.msra.mxu1 %v710_v32 }
 0x14f   :  { %664 = vmatprep.subr.bf16.mxu1 %v863_v0 }
 0x152   :  { %665 = vmatpush3.bf16.msra.mxu1 %v711_v33 }
 0x153   :  { %666 = vmatprep.subr.bf16.mxu1 %v863_v0 }
 0x156   :  { %667 = vmatpush3.bf16.msra.mxu1 %v712_v34 }
 0x157   :  { %668 = vmatprep.subr.bf16.mxu1 %v863_v0 }
 0x15a   :  { %669 = vmatpush3.bf16.msra.mxu1 %v713_v35 }
 0x15b   :  { %670 = vmatprep.subr.bf16.mxu1 %v863_v0 }
 0x15e   :  { %671 = vmatpush3.bf16.msra.mxu1 %v714_v44 }
 0x15f   :  { %672 = vmatprep.subr.bf16.mxu1 %v863_v0 }
 0x162   :  { %673 = vmatpush3.bf16.msra.mxu1 %v715_v45 }
 0x218   :  { %v291_v37 = vpop.f32.mrb[0].mxu1 }
 0x219   :  { %v292_v38 = vadd.f32 %v547_v36, %v291_v37  ;;  %v636_v39 = vpop.f32.mrb[1].mxu1 }
 0x21a   :  { %v294_v40 = vpop.f32.mrb[2].mxu1 }
 0x21b   :  { %v297_v41 = vmax.f32 %v292_v38, 0.0  ;;  %v637_v42 = vpop.f32.mrb[3].mxu1 }
 0x21d   :  { %v298_v43 = vpack.c.bf16 %v297_v41, %v297_v41 }
 0x21f   :  { %655 = vmatmul.mubr.bf16.vlgmr.msra.gmra.mrb[4].mxu0 %v298_v43 }
 0x2f2   :  { %v404_v47 = vpop.f32.mrb[4].mxu0 }
 0x2f3   :  { %v405_v48 = vadd.f32 %v556_v46, %v404_v47  ;;  %v656_v49 = vpop.f32.mrb[5].mxu0 }
 0x2f4   :  { %v407_v50 = vpop.f32.mrb[6].mxu0 }
 0x2f5   :  { %v410_v51 = vmax.f32 %v405_v48, 0.0  ;;  %v657_v52 = vpop.f32.mrb[7].mxu0 }
 0x2f7   :  { %v411_v53 = vpack.c.bf16 %v410_v51, %v410_v51 }
 0x2f9   :  { %675 = vmatmul.mubr.bf16.vlgmr.msra.gmra.mrb[4].mxu1 %v411_v53 }
 0x3cc   :  { %v517_v55 = vpop.f32.mrb[4].mxu1 }
 0x3cd   :  { %v518_v56 = vadd.f32 %v565_v54, %v517_v55  ;;  %v676_v57 = vpop.f32.mrb[5].mxu1 }
 0x3ce   :  { %v520_v58 = vpop.f32.mrb[6].mxu1 }
 0x3cf   :  { %523 = vst [vmem:[#allocation11] sm:$0xff] %v518_v56  ;;  %v677_v59 = vpop.f32.mrb[7].mxu1 }
 0x3d0   :  { %837 = shalt.err (!%p834_p2)
}
 0x3d1   :  { %s838_s8 = scalar_lea.hbm %s1057_s9, 128 }
 0x3d2   :  { %p839_p3 = scmp.ne.s32.totalorder %s1057_s9, %s838_s8  ;;  %p842_p4 = scmp.lt.u32.totalorder %s838_s8, %s1057_s9 }
 0x3d4   :  { %p844_p5 = pnand %p842_p4, %p839_p3 }
 0x3d6   :  { %847 = shalt.err (!%p844_p5)
}
 0x3d7   :  { %533 = dma.vmem_to_hbm [thread:$0]  %s531_s12, 128, %s1057_s9, [#allocation4]  }
 0x3d8   :  { %854 = dma.done.wait [#allocation4], 128  }
 0x3d9   :  { %855 = vsyncadd [#allocation4], 4294967168 }
 0x3da   :  { %537 = vsyncpa [#allocation3], 1 }
 0x3db   :  { %538 = vsyncpa [#allocation6], 1 }
 0x3dc   :  { %539 = vsyncpa [#allocation9], 1 }
 0x3dd   :  { %540 = vsyncpa [#allocation4], 1 }

</bundles_post_ra>
